<compile_context>
chip_gen: v7x
topology: tpu7x:2x2x1
jax: 0.10.0
libtpu: 0.0.40
codegen_flags: <defaults>
</compile_context>

<pallas_src>
import functools

import jax
import jax.numpy as jnp
from jax import lax
from jax.experimental import pallas as pl
from jax.experimental.pallas import tpu as pltpu

KSIZE = 7
DILATION = 3
PAD = DILATION * (KSIZE - 1) // 2  # = 9; keeps H, W unchanged


def _round_up(n, m):
    return -(-n // m) * m


# --------------------------------------------------------------------------- #
# kernel A: squeeze (1x1 conv)  ==  (Cm_pad, C) @ (C, strip_HW) matmul          #
# --------------------------------------------------------------------------- #
def _squeeze_kernel(x_ref, wsq_ref, bsq_ref, sq_ref, *, mxu_dtype):
    x = x_ref[0].astype(mxu_dtype)                                   # (C, strip_HW)
    sq = jnp.dot(wsq_ref[...], x, preferred_element_type=jnp.float32)
    sq = sq + bsq_ref[...]                                           # (Cm_pad, strip_HW)
    sq_ref[0] = sq.astype(sq_ref.dtype)


# --------------------------------------------------------------------------- #
# kernel B: dilated 7x7 conv + ReLU + expand (1x1) + sigmoid gate               #
# --------------------------------------------------------------------------- #
def _gate_kernel(x_ref, sqw_ref, wcv_ref, bcv_ref, wex_ref, bex_ref, o_ref,
                 *, W, halo, mxu_dtype):
    cm_pad = sqw_ref.shape[2]
    strip_hw = o_ref.shape[-1]

    # Image column of each output lane (strip_HW is a multiple of W, so the lane
    # index mod W is the true column).  Row validity is handled by the zero halo.
    col = lax.broadcasted_iota(jnp.int32, (1, strip_hw), 1) % W

    # Direct per-tap accumulation: no im2col scratch; the idle MXU absorbs the 49
    # shallow matmuls while vst/XLU traffic stays minimal.
    cv = jnp.zeros((cm_pad, strip_hw), jnp.float32)
    for ky in range(KSIZE):
        oy = ky * DILATION - PAD
        for kx in range(KSIZE):
            ox = kx * DILATION - PAD
            t = ky * KSIZE + kx
            off = halo + oy * W + ox            # static offset into the halo window
            tap = sqw_ref[0, 0, :, off:off + strip_hw]            # (Cm_pad, strip_HW)
            valid = (col + ox >= 0) & (col + ox < W)
            tap = jnp.where(valid, tap, jnp.zeros_like(tap))
            cv = cv + jnp.dot(wcv_ref[t], tap,
                              preferred_element_type=jnp.float32)

    cv = jnp.maximum(cv + bcv_ref[...], 0.0)                         # (Cm_pad, strip_HW)

    ex = jnp.dot(wex_ref[...], cv.astype(mxu_dtype),
                 preferred_element_type=jnp.float32)
    gate = jax.nn.sigmoid(ex + bex_ref[...])                         # (C, strip_HW) f32

    # x is only touched here (gate multiply): never kept live across the conv.
    o_ref[0] = (x_ref[0].astype(jnp.float32) * gate).astype(o_ref.dtype)


# --------------------------------------------------------------------------- #
# wrapper                                                                       #
# --------------------------------------------------------------------------- #
def _pick_strip_rows(H, W, C, itemsize, budget_bytes=8 << 20):
    """Largest row-strip whose (double-buffered) x + out blocks fit the budget."""
    cands = [sh for sh in range(1, H + 1)
             if H % sh == 0 and (sh == H or (sh * W) % 128 == 0)]
    if not cands:
        return H
    fit = [sh for sh in cands if 4 * C * sh * W * itemsize <= budget_bytes]
    return max(fit) if fit else min(cands)


def _vmem_limit(block_bytes):
    """Explicit scoped-VMEM limit: double-buffered blocks + headroom, v7x-safe cap."""
    need = 2 * sum(block_bytes)
    need = need * 5 // 4 + (2 << 20)
    return int(min(max(need, 32 << 20), 64 << 20))


def spatial_gate2d_v2(x_nchw, torch_params, *, strip_rows=None,
                      mxu_dtype=jnp.bfloat16):
    """SpatialGate2dV2 forward.  torch_params use PyTorch layouts; x is NCHW."""
    w_sq, b_sq, w_cv, b_cv, w_ex, b_ex = torch_params
    Cm, C = w_sq.shape
    N, Cx, H, W = x_nchw.shape
    assert Cx == C
    HW = H * W
    Cm_pad = _round_up(max(Cm, 8), 8)             # full-sublane tap tiles
    io_dtype = x_nchw.dtype
    f32 = jnp.float32

    if strip_rows is None:
        strip_rows = _pick_strip_rows(H, W, C, jnp.dtype(io_dtype).itemsize)
    assert H % strip_rows == 0, "strip_rows must divide H"
    assert strip_rows == H or (strip_rows * W) % 128 == 0, (
        "strip lane width must be a multiple of 128 (or one whole-image strip)")
    num_strips = H // strip_rows
    strip_hw = strip_rows * W
    halo = PAD * W + PAD                          # zero-halo lanes on each side
    halo_hw = strip_hw + 2 * halo

    # Free reshape -- no transpose; spatial stays lane-dense; native I/O dtype.
    x = x_nchw.reshape(N, C, HW)

    # ---- weight layouts: channel-padded, MXU dtype; biases stay f32 ----
    wsq_k = jnp.zeros((Cm_pad, C), mxu_dtype).at[:Cm, :].set(w_sq.astype(mxu_dtype))
    bsq_k = jnp.zeros((Cm_pad, 1), f32).at[:Cm, :].set(b_sq.astype(f32)[:, None])
    # (O, I, ky, kx) -> (49, O, I), zero-padded to (49, Cm_pad, Cm_pad)
    wcv_t = jnp.transpose(w_cv, (2, 3, 0, 1)).reshape(KSIZE * KSIZE, Cm, Cm)
    wcv_k = jnp.zeros((KSIZE * KSIZE, Cm_pad, Cm_pad), mxu_dtype
                      ).at[:, :Cm, :Cm].set(wcv_t.astype(mxu_dtype))
    bcv_k = jnp.zeros((Cm_pad, 1), f32).at[:Cm, :].set(b_cv.astype(f32)[:, None])
    wex_k = jnp.zeros((C, Cm_pad), mxu_dtype).at[:, :Cm].set(w_ex.astype(mxu_dtype))
    bex_k = b_ex.astype(f32)[:, None]

    # ---- kernel A: squeezed map (N, Cm_pad, HW), stored in MXU dtype ----
    a_blocks = [C * strip_hw * jnp.dtype(io_dtype).itemsize,
                Cm_pad * strip_hw * jnp.dtype(mxu_dtype).itemsize]
    sq = pl.pallas_call(
        functools.partial(_squeeze_kernel, mxu_dtype=mxu_dtype),
        out_shape=jax.ShapeDtypeStruct((N, Cm_pad, HW), mxu_dtype),
        grid_spec=pltpu.PrefetchScalarGridSpec(
            num_scalar_prefetch=0,
            grid=(N, num_strips),
            in_specs=[
                pl.BlockSpec((1, C, strip_hw), lambda b, s: (b, 0, s)),
                pl.BlockSpec((Cm_pad, C), lambda b, s: (0, 0)),
                pl.BlockSpec((Cm_pad, 1), lambda b, s: (0, 0)),
            ],
            out_specs=pl.BlockSpec((1, Cm_pad, strip_hw), lambda b, s: (b, 0, s)),
        ),
        compiler_params=pltpu.CompilerParams(
            dimension_semantics=("parallel", "parallel"),
            vmem_limit_bytes=_vmem_limit(a_blocks)),
    )(x, wsq_k, bsq_k)

    # ---- halo windows of the squeezed map (tiny tensor; plain XLA ops) ----
    # Zero flat halo of PAD*W+PAD lanes supplies the conv's vertical zero-padding
    # and keeps every in-kernel tap slice within its window (static offsets only).
    sq_padded = jnp.pad(sq, ((0, 0), (0, 0), (halo, halo)))
    sq_win = jnp.stack(
        [sq_padded[:, :, s * strip_hw: s * strip_hw + halo_hw]
         for s in range(num_strips)], axis=1)           # (N, S, Cm_pad, halo_HW)

    # ---- kernel B: conv + ReLU + expand + sigmoid gate, strip-tiled ----
    b_blocks = [C * strip_hw * jnp.dtype(io_dtype).itemsize,         # x strip
                C * strip_hw * jnp.dtype(io_dtype).itemsize,         # out strip
                Cm_pad * halo_hw * jnp.dtype(mxu_dtype).itemsize]    # sq window
    out = pl.pallas_call(
        functools.partial(_gate_kernel, W=W, halo=halo, mxu_dtype=mxu_dtype),
        out_shape=jax.ShapeDtypeStruct((N, C, HW), io_dtype),
        grid_spec=pltpu.PrefetchScalarGridSpec(
            num_scalar_prefetch=0,
            grid=(N, num_strips),
            in_specs=[
                pl.BlockSpec((1, C, strip_hw), lambda b, s: (b, 0, s)),
                pl.BlockSpec((1, 1, Cm_pad, halo_hw), lambda b, s: (b, s, 0, 0)),
                pl.BlockSpec((KSIZE * KSIZE, Cm_pad, Cm_pad), lambda b, s: (0, 0, 0)),
                pl.BlockSpec((Cm_pad, 1), lambda b, s: (0, 0)),
                pl.BlockSpec((C, Cm_pad), lambda b, s: (0, 0)),
                pl.BlockSpec((C, 1), lambda b, s: (0, 0)),
            ],
            out_specs=pl.BlockSpec((1, C, strip_hw), lambda b, s: (b, 0, s)),
        ),
        compiler_params=pltpu.CompilerParams(
            dimension_semantics=("parallel", "parallel"),
            vmem_limit_bytes=_vmem_limit(b_blocks)),
    )(x, sq_win, wcv_k, bcv_k, wex_k, bex_k)

    return out.reshape(N, C, H, W)                # free reshape back to NCHW


# --------------------------------------------------------------------------- #
# reference + test harness                                                      #
# --------------------------------------------------------------------------- #
def init_params(key, channels, reduction=4):
    """Deterministic synthetic parameters, PyTorch layouts."""
    cm = channels // reduction
    ks = jax.random.split(key, 6)
    w_sq = 0.1 * jax.random.normal(ks[0], (cm, channels), jnp.float32)          # 1x1 (O, I)
    b_sq = 0.1 * jax.random.normal(ks[1], (cm,), jnp.float32)
    w_cv = 0.1 * jax.random.normal(ks[2], (cm, cm, KSIZE, KSIZE), jnp.float32)  # OIHW
    b_cv = 0.1 * jax.random.normal(ks[3], (cm,), jnp.float32)
    w_ex = 0.1 * jax.random.normal(ks[4], (channels, cm), jnp.float32)          # 1x1 (O, I)
    b_ex = 0.1 * jax.random.normal(ks[5], (channels,), jnp.float32)
    return (w_sq, b_sq, w_cv, b_cv, w_ex, b_ex)


def ref_forward(x, torch_params):
    """Pure-JAX reference (XLA convs) mirroring the PyTorch forward exactly."""
    w_sq, b_sq, w_cv, b_cv, w_ex, b_ex = torch_params
    dn = ("NCHW", "OIHW", "NCHW")
    hp = lax.Precision.HIGHEST
    s = lax.conv_general_dilated(x, w_sq[:, :, None, None], (1, 1), "VALID",
                                 dimension_numbers=dn, precision=hp)
    s = s + b_sq[None, :, None, None]
    c = lax.conv_general_dilated(s, w_cv, (1, 1), [(PAD, PAD), (PAD, PAD)],
                                 rhs_dilation=(DILATION, DILATION),
                                 dimension_numbers=dn, precision=hp)
    c = c + b_cv[None, :, None, None]
    c = jnp.maximum(c, 0.0)
    e = lax.conv_general_dilated(c, w_ex[:, :, None, None], (1, 1), "VALID",
                                 dimension_numbers=dn, precision=hp)
    e = e + b_ex[None, :, None, None]
    return x * jax.nn.sigmoid(e)


if __name__ == "__main__":
    key = jax.random.PRNGKey(0)
    k_x, k_p = jax.random.split(key)

    N, C, H, W = 2, 8, 16, 16          # channels=8, reduction=4 -> mid=2 (padded to 8)
    x = jax.random.normal(k_x, (N, C, H, W), jnp.float32)
    params = init_params(k_p, C, reduction=4)

    ref = jax.block_until_ready(ref_forward(x, params))

    # f32 MXU path with 2 row-strips (exercises the strip + halo path), tight tolerance.
    out_f32 = jax.block_until_ready(
        spatial_gate2d_v2(x, params, strip_rows=8, mxu_dtype=jnp.float32))
    assert out_f32.shape == (N, C, H, W)
    err_f32 = float(jnp.max(jnp.abs(out_f32 - ref)))
    assert bool(jnp.allclose(out_f32, ref, atol=5e-3, rtol=5e-3)), (
        "f32 mismatch, max abs err = %e" % err_f32)

    # bf16 MXU path (production default), same strip tiling, bf16-level tolerance.
    out_bf16 = jax.block_until_ready(spatial_gate2d_v2(x, params, strip_rows=8))
    err_bf16 = float(jnp.max(jnp.abs(out_bf16 - ref)))
    assert bool(jnp.allclose(out_bf16, ref, atol=3e-2, rtol=3e-2)), (
        "bf16 mismatch, max abs err = %e" % err_bf16)

    print("KERNEL_OK")
</pallas_src>

<mosaic_0001>
module attributes {stable_mosaic.version = 11 : i64} {
  func.func @_squeeze_kernel(%arg0: i32, %arg1: i32, %arg2: memref<1x8x128xf32, #tpu.memory_space<vmem>>, %arg3: memref<8x8xf32, #tpu.memory_space<vmem>>, %arg4: memref<8x1xf32, #tpu.memory_space<vmem>>, %arg5: memref<1x8x128xf32, #tpu.memory_space<vmem>>) attributes {dimension_semantics = [#tpu.dimension_semantics<parallel>, #tpu.dimension_semantics<parallel>], iteration_bounds = array<i64: 2, 2>, scalar_prefetch = 0 : i64, scratch_operands = 0 : i64, tpu.core_type = #tpu.core_type<tc>, window_params = [{transform_indices = @transform_0, window_bounds = array<i64: 1, 8, 128>}, {pipeline_mode = #tpu.pipeline_mode<synchronous>, transform_indices = @transform_1, window_bounds = array<i64: 8, 8>}, {pipeline_mode = #tpu.pipeline_mode<synchronous>, transform_indices = @transform_2, window_bounds = array<i64: 8, 1>}, {transform_indices = @transform_3, window_bounds = array<i64: 1, 8, 128>}]} {
    %c0 = arith.constant 0 : index
    %c0_0 = arith.constant 0 : index
    %c0_1 = arith.constant 0 : index
    %0 = vector.load %arg2[%c0, %c0_0, %c0_1] : memref<1x8x128xf32, #tpu.memory_space<vmem>>, vector<1x8x128xf32>
    %1 = vector.shape_cast %0 : vector<1x8x128xf32> to vector<8x128xf32>
    %c0_2 = arith.constant 0 : index
    %c0_3 = arith.constant 0 : index
    %2 = vector.load %arg3[%c0_2, %c0_3] : memref<8x8xf32, #tpu.memory_space<vmem>>, vector<8x8xf32>
    %cst = arith.constant dense<0.000000e+00> : vector<8x128xf32>
    %3 = tpu.matmul %2, %1, %cst {dimension_numbers = #tpu.dot_dimension_numbers<[1], [0], [0], [1], [0, 0, 1, 1], [], []>} : vector<8x8xf32>, vector<8x128xf32>, vector<8x128xf32> -> vector<8x128xf32>
    %c0_4 = arith.constant 0 : index
    %c0_5 = arith.constant 0 : index
    %4 = vector.load %arg4[%c0_4, %c0_5] : memref<8x1xf32, #tpu.memory_space<vmem>>, vector<8x1xf32>
    %5 = vector.broadcast %4 : vector<8x1xf32> to vector<8x128xf32>
    %6 = arith.addf %3, %5 : vector<8x128xf32>
    %c0_6 = arith.constant 0 : index
    %c0_7 = arith.constant 0 : index
    %c0_8 = arith.constant 0 : index
    %7 = vector.load %arg5[%c0_6, %c0_7, %c0_8] : memref<1x8x128xf32, #tpu.memory_space<vmem>>, vector<1x8x128xf32>
    %8 = vector.shape_cast %7 : vector<1x8x128xf32> to vector<8x128xf32>
    %9 = vector.shape_cast %6 : vector<8x128xf32> to vector<1x8x128xf32>
    tpu.vector_store %arg5[%c0_6, %c0_7, %c0_8], %9 {strides = array<i32>} : memref<1x8x128xf32, #tpu.memory_space<vmem>>, vector<1x8x128xf32>,
    return
  }
  func.func @transform_0(%arg0: i32, %arg1: i32) -> (i32, i32, i32) {
    %c0_i32 = arith.constant 0 : i32
    %c0_i32_0 = arith.constant 0 : i32
    return %arg0, %c0_i32, %arg1 : i32, i32, i32
  }
  func.func @transform_1(%arg0: i32, %arg1: i32) -> (i32, i32) {
    %c0_i32 = arith.constant 0 : i32
    %c0_i32_0 = arith.constant 0 : i32
    %c0_i32_1 = arith.constant 0 : i32
    return %c0_i32, %c0_i32_0 : i32, i32
  }
  func.func @transform_2(%arg0: i32, %arg1: i32) -> (i32, i32) {
    %c0_i32 = arith.constant 0 : i32
    %c0_i32_0 = arith.constant 0 : i32
    %c0_i32_1 = arith.constant 0 : i32
    return %c0_i32, %c0_i32_0 : i32, i32
  }
  func.func @transform_3(%arg0: i32, %arg1: i32) -> (i32, i32, i32) {
    %c0_i32 = arith.constant 0 : i32
    %c0_i32_0 = arith.constant 0 : i32
    return %arg0, %c0_i32, %arg1 : i32, i32, i32
  }
}

</mosaic_0001>

<bundles_post_ra>
// kernel: tpu_custom_call.1
= control target key start
LH: loop header
LB: loop body
LE: loop exit
PB: predicated region body
PF: predicated region fallthrough
CT: control target
= control target key end

     0   :  { %8 = vsyncpa [#allocation3], 0  ;;  %s848_s0 = inlined_call_operand.hbm [shape: f32[2,8,256], index: 0, kind: input, shape index: {}]   ;;  %s849_s1 = inlined_call_operand.vmem [shape: f32[8,8], index: 1, kind: input, shape index: {}]   ;;  %s850_s2 = inlined_call_operand.vmem [shape: f32[8,1], index: 2, kind: input, shape index: {}]   ;;  %s851_s3 = inlined_call_operand.hbm [shape: f32[2,8,256], index: 3, kind: output, shape index: {}]  }
   0x1   :  { %10 = vsyncpa [#allocation3 + $0x1], 0 }
   0x2   :  { %11 = vsyncpa [#allocation4], 0 }
   0x3   :  { %13 = vsyncpa [#allocation4 + $0x1], 0  ;;  %s648_s12 = smov 0   ;;  %s650_s13 = smov 0  }
   0x4   :  { %s652_s14 = smov 0   ;;  %s654_s15 = smov 0  }
   0x5   :  { %s656_s16 = smov 0   ;;  %s658_s17 = smov 0  }
   0x6   :  { %s660_s18 = smov 0   ;;  %s662_s19 = smov 0  }
   0x7 LB: > { %s388_s20 = sadd.s32 4294967295, %s621_s19   ;;  %s389_s21 = sadd.s32 4294967294, %s621_s19   ;;  %s621_s19 = sphi %s662_s19, %s19_s19   ;;  %s617_s18 = sphi %s660_s18, %s868_s18   ;;  %s613_s17 = sphi %s658_s17, %s867_s17   ;;  %s609_s16 = sphi %s656_s16, %s866_s16   ;;  %s605_s15 = sphi %s654_s15, %s865_s15   ;;  %s601_s14 = sphi %s652_s14, %s864_s14   ;;  %s597_s13 = sphi %s650_s13, %s863_s13   ;;  %s593_s12 = sphi %s648_s12, %s862_s12  }
   0x8   : > { %s28_s22 = sadd.s32 1, %s613_s17  ;;  %s31_s23 = sadd.s32 1, %s617_s18 }
   0x9   : > { %p29_p0 = scmp.ge.s32.totalorder %s28_s22, 2  ;;  %s40_s24 = sadd.s32 1, %s601_s14 }
   0xa   : > { %p47_p1 = scmp.ne.s32.totalorder %s601_s14, %s597_s13  ;;  %p48_p2 = scmp.eq.s32.totalorder %s621_s19, 0 }
   0xb   : > { %s870_s22 = smov (%p29_p0, %s28_s22), 0  ;;  %s872_s23 = smov (!%p29_p0, %s31_s23), %s617_s18 }
   0xc   : > { %s36_s25 = ssub.s32 %s613_s17, %s870_s22  ;;  %p701_p3 = por %p48_p2, %p47_p1 }
   0xd   : > { %p33_p4 = scmp.ge.s32.totalorder %s872_s23, 2  ;;  %p53_p5 = scmp.ne.s32.totalorder %s597_s13, %s593_s12 }
   0xe   : > { %p54_p6 = scmp.eq.s32.totalorder %s388_s20, 0  ;;  %p121_p7 = scmp.eq.s32.totalorder %s388_s20, 3 }
   0xf   : > { %s874_s23 = smov (%p33_p4, %s872_s23), 0  ;;  %p127_p10 = scmp.eq.s32.totalorder %s389_s21, 3 }
  0x10   : > { %p709_p8 = por %p54_p6, %p53_p5  ;;  %p713_p9 = por %p121_p7, %p47_p1 }
  0x11   : > { %s35_s29 = ssub.s32 %s617_s18, %s874_s23  ;;  %p719_p12 = por %p127_p10, %p53_p5 }
  0x12   : > { %s855_s28 = scalar_select %p713_p9, 1, 0 }
  0x13   : > { %s37_s30 = sor.u32 %s36_s25, %s35_s29  ;;  %p423_p13 = scmp.lt.s32.totalorder %s621_s19, 4 }
  0x14   : > { %p38_p11 = scmp.eq.s32.totalorder %s37_s30, 0  ;;  %s153_s5 = sand.u32 1, %s601_s14  }
  0x15   : > { %s856_s4 = scalar_select %p719_p12, 1, 0 }
  0x16   : > { %s726_s6 = scalar_select %p38_p11, %s601_s14, %s40_s24  }
  0x17   : > { %s392_s7 = sshll.u32 %s153_s5, 3  ;;  %s393_s8 = sshll.u32 %s617_s18, 1 }
  0x18   : > { %s162_s9 = sadd.s32 %s613_s17, %s393_s8  ;;  %s157_s10 = scalar_lea.vmem [#allocation2], %s392_s7 }
  0x19   : > { %s166_s11 = sshll.u32 %s157_s10, 4  ;;  %s394_s20 = sshll.u32 %s162_s9, 7  ;;  %s730_s11 = int_to_ptr.vmem [resolvable:$true] %s166_s11 }
  0x1a   : > { %s735_s29 = scalar_lea.hbm %s848_s0, %s394_s20  ;;  %p739_p0 = pnand %p423_p13, %p701_p3 }
  0x1b   : > { %s154_s30 = scalar_lea.sflag [#allocation3], %s153_s5  ;;  %s493_s7 = scalar_lea.hbm %s735_s29, 128 }
  0x1c   : > { %p494_p4 = scmp.ne.s32.totalorder %s735_s29, %s493_s7  ;;  %p495_p5 = pneg %p739_p0 }
  0x1d   : > { %s498_s9 = scalar_lea.hbm %s848_s0, 512  ;;  %p499_p3 = scmp.lt.u32.totalorder %s735_s29, %s848_s0 }
  0x1e   : > { %p496_p6 = pnand %p495_p5, %p494_p4  ;;  %p500_p10 = scmp.lt.u32.totalorder %s498_s9, %s493_s7 }
  0x1f   : > { %p502_p13 = scmp.lt.u32.totalorder %s493_s7, %s735_s29 }
  0x20   : > { %p497_p7 = pneg %p496_p6  ;;  %p501_p11 = por %p500_p10, %p499_p3 }
  0x22   : > { %p503_p1 = por %p502_p13, %p501_p11 }
  0x24   : > { %p504_p2 = pnand %p503_p1, %p497_p7 }
  0x26   : > { %507 = shalt.err (!%p504_p2)
}
  0x27   : > { %s508_s5 = scalar_lea.vmem %s730_s11, 128  ;;  %s623_s21 = smov [#allocation2]  }
  0x28   : > { %p509_p4 = scmp.ne.s32.totalorder %s730_s11, %s508_s5  ;;  %s513_s25 = sshll.u32 %s623_s21, 4  ;;  %s514_s25 = int_to_ptr.vmem [resolvable:$false] %s513_s25 }
  0x29   : > { %s515_s26 = scalar_lea.vmem %s514_s25, 256  ;;  %p516_p9 = scmp.lt.s32.totalorder %s730_s11, %s514_s25 }
  0x2a   : > { %p511_p6 = pnand %p509_p4, %p495_p5  ;;  %p517_p3 = scmp.lt.s32.totalorder %s515_s26, %s508_s5 }
  0x2c   : > { %p512_p12 = pneg %p511_p6  ;;  %p518_p10 = por %p517_p3, %p516_p9 }
  0x2e   : > { %p519_p11 = pnand %p518_p10, %p512_p12 }
  0x30   : > { %522 = shalt.err (!%p519_p11)
}
  0x31   : > { %418 = dma.hbm_to_vmem [thread:$0]  (!%p739_p0), %s735_s29, 128, %s730_s11, %s154_s30  }
  0x32   : > { %p858_p1 = scmp.lt.s32.totalorder %s621_s19, 5  ;;  %p859_p2 = scmp.ge.s32.totalorder %s621_s19, 1 }
  0x34   : > { %p172_p5 = pnand %p859_p2, %p858_p1 }
  0x35   : > { %s775_s7 = sand.u32 (!%p172_p5), 1, %s597_s13  }
  0x36   : > { %175 = sbr.rel (%p172_p5) target bundleno = 293 (0x125), region = 32  ;;  %s396_s8 = sshll.u32 (!%p172_p5), %s775_s7, 3 }
  0x37   : > { %s178_s9 = scalar_lea.sflag (!%p172_p5), [#allocation3], %s775_s7  ;;  %s181_s10 = scalar_lea.vmem (!%p172_p5), [#allocation2], %s396_s8 }
  0x3d   : > { %584 = dma.done.wait (%p709_p8), %s178_s9, 128  }
  0x3e   : > { %586 = vsyncadd (%p709_p8), %s178_s9, 4294967168  ;;  %v624_v0 = vmov 0.0   ;;  %vm625_vm0 = vmmov 0   ;;  %v626_v1 = vmov 0   ;;  %vm212_vm1 = vcmask 64512   ;;  %v204_v2 = vld [vmem:[%s181_s10] sm:$0xff] }
  0x3f   : > { %406 = vmatprep.subr.mxu0 %v624_v0  ;;  %408 = vmatprep.mubr.msk.f32.mxu0 %vm625_vm0, %v624_v0  ;;  %v205_v3 = vld [vmem:[%s849_s1] sm:$0xff]  ;;  %s400_s27 = sshll.u32 %s609_s16, 1  ;;  %s203_s21 = scalar_lea.vmem [#allocation5], %s396_s8 }
  0x40   : > { %492 = vset.pattern.permute.xlu0 %v626_v1  ;;  %v206_v4 = vld [vmem:[%s850_s2] sm:$0xff]  ;;  %407 = vmatpush3.msra.mxu0 %v204_v2  ;;  %s299_s20 = sadd.s32 %s605_s15, %s400_s27  ;;  %s303_s25 = sshll.u32 %s203_s21, 4  ;;  %s796_s25 = int_to_ptr.vmem [resolvable:$true] %s303_s25 }
  0x41   : > { %209 = vperm.xlu0 %492, %v206_v4   ;;  %409 = vmatmul.mubr.msk.f32.vlgmr.msra.gmra.mrb[0].mxu0 %vm212_vm1, %v205_v3  ;;  %s401_s5 = sshll.u32 %s299_s20, 7  ;;  %s288_s16 = scalar_lea.sflag [#allocation4], %s775_s7 }
  0x42   : > { %s794_s10 = scalar_lea.hbm %s851_s3, %s401_s5  ;;  %s523_s15 = scalar_lea.vmem %s796_s25, 128 }
  0x43   : > { %p524_p8 = scmp.ne.s32.totalorder %s796_s25, %s523_s15  ;;  %p860_p9 = scmp.ne.s32.totalorder %s855_s28, 0 }
  0x44   : > { %s627_s8 = smov [#allocation5]  }
  0x45   : > { %p525_p12 = pnand %p524_p8, %p860_p9  ;;  %s527_s11 = sshll.u32 %s627_s8, 4  ;;  %s528_s11 = int_to_ptr.vmem [resolvable:$false] %s527_s11 }
  0x46   : > { %s529_s29 = scalar_lea.vmem %s528_s11, 256  ;;  %p530_p7 = scmp.lt.s32.totalorder %s796_s25, %s528_s11 }
  0x47   : > { %p526_p0 = pneg %p525_p12  ;;  %p531_p13 = scmp.lt.s32.totalorder %s529_s29, %s523_s15 }
  0x49   : > { %p532_p4 = por %p531_p13, %p530_p7 }
  0x4b   : > { %p533_p6 = pnand %p532_p4, %p526_p0 }
  0xc0   : > { %v210_v5 = vpop.permute.xlu0 %209 }
 0x114   : > { %v282_v6 = vpop.f32.mrb[0].mxu0 }
 0x115   : > { %v283_v7 = vadd.f32 %v282_v6, %v210_v5  ;;  %v410_v8 = vpop.f32.mrb[1].mxu0 }
 0x117   : > { %286 = vst [vmem:[%s203_s21] sm:$0xff] %v283_v7 }
 0x118   : > { %536 = shalt.err (!%p533_p6)
}
 0x119   : > { %s537_s7 = scalar_lea.hbm %s794_s10, 128  ;;  %s541_s27 = scalar_lea.hbm %s851_s3, 512 }
 0x11a   : > { %p538_p3 = scmp.ne.s32.totalorder %s794_s10, %s537_s7  ;;  %p542_p1 = scmp.lt.u32.totalorder %s794_s10, %s851_s3 }
 0x11b   : > { %p543_p2 = scmp.lt.u32.totalorder %s541_s27, %s537_s7  ;;  %p545_p8 = scmp.lt.u32.totalorder %s537_s7, %s794_s10 }
 0x11c   : > { %p539_p10 = pnand %p538_p3, %p860_p9 }
 0x11d   : > { %p544_p5 = por %p543_p2, %p542_p1 }
 0x11e   : > { %p540_p11 = pneg %p539_p10 }
 0x11f   : > { %p546_p12 = por %p545_p8, %p544_p5 }
 0x121   : > { %p547_p0 = pnand %p546_p12, %p540_p11 }
 0x123   : > { %550 = shalt.err (!%p547_p0)
}
 0x124   : > { %413 = dma.vmem_to_hbm [thread:$0]  (%p860_p9), %s796_s25, 128, %s794_s10, %s288_s16  }
 0x125 PF: > { %p424_p7 = scmp.ge.s32.totalorder %s621_s19, 2  ;;  %s315_s21 = sand.u32 1, %s593_s12  }
 0x126   : > { %p861_p13 = scmp.ne.s32.totalorder %s856_s4, 0  ;;  %s316_s26 = scalar_lea.sflag [#allocation4], %s315_s21 }
 0x128   : > { %p420_p4 = pnand %p424_p7, %p861_p13 }
 0x12a   : > { %588 = dma.done.wait (!%p420_p4), %s316_s26, 128  }
 0x12b   : > { %590 = vsyncadd (!%p420_p4), %s316_s26, 4294967168  ;;  %s19_s19 = sadd.s32 1, %s621_s19   ;;  %s862_s12 = smov %s597_s13 }
 0x12c   : > { %p16_p6 = scmp.ge.s32.totalorder %s19_s19, 6   ;;  %s863_s13 = smov %s601_s14 }
 0x12d   : > { %s864_s14 = smov %s726_s6  ;;  %s865_s15 = smov %s613_s17 }
 0x12e   : > { %s866_s16 = smov %s617_s18  ;;  %s867_s17 = smov %s870_s22 }
 0x12f   : > { %s868_s18 = smov %s874_s23  ;;  %18 = sbr.rel (!%p16_p6) target bundleno = 7 (0x7), region = 77 }
 0x136   :  { %321 = vsyncpa [#allocation3], 1 }
 0x137   :  { %323 = vsyncpa [#allocation3 + $0x1], 1 }
 0x138   :  { %324 = vsyncpa [#allocation4], 1 }
 0x139   :  { %326 = vsyncpa [#allocation4 + $0x1], 1 }

</bundles_post_ra>
